<compile_context>
chip_gen: v7x
topology: tpu7x:2x2x1
jax: 0.10.0
libtpu: 0.0.40
codegen_flags: <defaults>
</compile_context>

<pallas_src>
import jax
import jax.numpy as jnp
from jax.experimental import pallas as pl
from jax.experimental.pallas import tpu as pltpu

_LANE = 128
_SUBLANE_F32 = 8
_SUBLANE_BF16 = 16


def _round_up(x, m):
    return (x + m - 1) // m * m


def _cls_classifier_kernel(cls_ref, wt_ref, b_ref, logits_ref):
    # cls_ref: (tb, H) CLS slab. dropout(p=0.1) is identity at eval time.
    # TODO(synk): training-mode dropout would need pltpu.prng_seed/prng_random_bits.
    acc = jnp.dot(cls_ref[...].astype(jnp.bfloat16),      # bf16 MXU operands
                  wt_ref[...],                            # (H, C_pad) bf16
                  preferred_element_type=jnp.float32)     # f32 accumulation
    logits_ref[...] = acc + b_ref[...]                    # bias add kept in f32


def prepare_classifier_params(cls_weight, cls_bias):
    """One-time prep of nn.Linear(768, clsNum) params: transpose + lane-pad + bf16.

    Done once and cached in production; replaces a per-call `cls_weight.T`.
    """
    C, H = cls_weight.shape
    C_pad = _round_up(C, _LANE)
    wt = jnp.zeros((H, C_pad), jnp.bfloat16)
    wt = wt.at[:, :C].set(cls_weight.T.astype(jnp.bfloat16))      # (H, C_pad)
    b = jnp.zeros((1, C_pad), jnp.float32)
    b = b.at[0, :C].set(cls_bias.astype(jnp.float32))             # (1, C_pad)
    return wt, b


def _pick_batch_tile(B, sublane):
    """Batch tile: one tile for small B; otherwise >=2 even tiles (v7x megacore),
    capped at 1024 rows so live VMEM stays ~8 MiB on every generation."""
    B_aligned = _round_up(B, sublane)
    if B_aligned <= 256:
        return B_aligned
    half = _round_up(pl.cdiv(B_aligned, 2), sublane)
    return min(1024, half)


def continuous_prompt_forward(hidden_states, wt_padded, bias_padded, num_classes):
    """Pallas implementation of ContinuousPrompt.forward (post-backbone).

    hidden_states: (B, S, H) f32/bf16 -- backbone last hidden state
    wt_padded    : (H, C_pad) bf16    -- from prepare_classifier_params
    bias_padded  : (1, C_pad) f32     -- from prepare_classifier_params
    returns (CLSEmbedding_, logits) with shapes (B, H) and (B, C) .
    """
    B, S, H = hidden_states.shape
    C_pad = wt_padded.shape[1]

    # CLSEmbedding_ = hidden_states[:, 0]: a single strided-slice pass in the
    # wrapper (the module materializes this tensor anyway). The kernel then sees
    # a plain 2-D slab -- no size-1 sequence block, no masked sub-tile DMA, and
    # any batch padding below touches only B*H elements, never B*S*H.
    cls = hidden_states[:, 0, :]

    sublane = _SUBLANE_BF16 if cls.dtype == jnp.bfloat16 else _SUBLANE_F32
    tb = _pick_batch_tile(B, sublane)
    B_pad = _round_up(B, tb)
    cls_in = cls if B_pad == B else jnp.pad(cls, ((0, B_pad - B), (0, 0)))

    itemsize = jnp.dtype(cls.dtype).itemsize
    cost = pl.CostEstimate(
        flops=2 * B_pad * H * C_pad,
        transcendentals=0,
        bytes_accessed=(B_pad * H * itemsize          # CLS slab read
                        + H * C_pad * 2               # bf16 weight read
                        + C_pad * 4                   # bias read
                        + B_pad * C_pad * 4),         # logits write
    )

    logits = pl.pallas_call(
        _cls_classifier_kernel,
        out_shape=jax.ShapeDtypeStruct((B_pad, C_pad), jnp.float32),
        grid=(B_pad // tb,),
        in_specs=[
            pl.BlockSpec((tb, H), lambda i: (i, 0)),
            # Grid-invariant index maps: weight/bias are DMA'd once and reused.
            pl.BlockSpec((H, C_pad), lambda i: (0, 0)),
            pl.BlockSpec((1, C_pad), lambda i: (0, 0)),
        ],
        out_specs=pl.BlockSpec((tb, C_pad), lambda i: (i, 0)),
        compiler_params=pltpu.CompilerParams(
            dimension_semantics=("parallel",)),
        cost_estimate=cost,
    )(cls_in, wt_padded, bias_padded)

    # Strip batch/lane padding; return (CLSEmbedding_, logits) like the module.
    return cls, logits[:B, :num_classes]


if __name__ == "__main__":
    # Small shapes consistent with the module: hidden size 768 (BERT),
    # clsNum small, short sequence, tiny batch.
    B, S, H, C = 2, 8, 768, 4

    key = jax.random.PRNGKey(0)
    k_hid, k_w, k_b = jax.random.split(key, 3)

    # Synthetic "backbone last hidden state" (stands in for BERT output).
    hidden_states = jax.random.normal(k_hid, (B, S, H), dtype=jnp.float32)

    # Deterministic parameters for linearClsfier = nn.Linear(768, clsNum).
    cls_weight = jax.random.normal(k_w, (C, H), dtype=jnp.float32) * 0.02
    cls_bias = jax.random.normal(k_b, (C,), dtype=jnp.float32) * 0.02

    # One-time parameter prep (cached in production).
    wt_padded, bias_padded = prepare_classifier_params(cls_weight, cls_bias)

    cls_emb, logits = continuous_prompt_forward(
        hidden_states, wt_padded, bias_padded, num_classes=C)
    jax.block_until_ready((cls_emb, logits))

    # Pure-JAX reference check.
    ref_cls = hidden_states[:, 0, :]
    ref_logits = ref_cls @ cls_weight.T + cls_bias
    assert cls_emb.shape == (B, H) and logits.shape == (B, C)
    # CLS embedding is an exact pass-through.
    assert jnp.allclose(cls_emb, ref_cls, atol=1e-6)
    # Logits use bf16 MXU operands with f32 accumulation -> relaxed tolerance
    # (intentional precision change vs the f32 PyTorch nn.Linear).
    assert jnp.allclose(logits, ref_logits, atol=5e-2, rtol=5e-2)

    print("KERNEL_OK")
</pallas_src>

<mosaic_0001>
module attributes {stable_mosaic.version = 11 : i64} {
  func.func @_cls_classifier_kernel(%arg0: i32, %arg1: memref<8x768xf32, #tpu.memory_space<vmem>>, %arg2: memref<768x128xbf16, #tpu.memory_space<vmem>>, %arg3: memref<1x128xf32, #tpu.memory_space<vmem>>, %arg4: memref<8x128xf32, #tpu.memory_space<vmem>>) attributes {dimension_semantics = [#tpu.dimension_semantics<parallel>], iteration_bounds = array<i64: 1>, scalar_prefetch = 0 : i64, scratch_operands = 0 : i64, tpu.core_type = #tpu.core_type<tc>, window_params = [{transform_indices = @transform_0, window_bounds = array<i64: 8, 768>}, {pipeline_mode = #tpu.pipeline_mode<synchronous>, transform_indices = @transform_1, window_bounds = array<i64: 768, 128>}, {pipeline_mode = #tpu.pipeline_mode<synchronous>, transform_indices = @transform_2, window_bounds = array<i64: 1, 128>}, {transform_indices = @transform_3, window_bounds = array<i64: 8, 128>}]} {
    %c0 = arith.constant 0 : index
    %c0_0 = arith.constant 0 : index
    %0 = vector.load %arg1[%c0, %c0_0] : memref<8x768xf32, #tpu.memory_space<vmem>>, vector<8x768xf32>
    %1 = arith.truncf %0 : vector<8x768xf32> to vector<8x768xbf16>
    %c0_1 = arith.constant 0 : index
    %c0_2 = arith.constant 0 : index
    %2 = vector.load %arg2[%c0_1, %c0_2] : memref<768x128xbf16, #tpu.memory_space<vmem>>, vector<768x128xbf16>
    %cst = arith.constant dense<0.000000e+00> : vector<8x128xf32>
    %3 = tpu.matmul %1, %2, %cst {dimension_numbers = #tpu.dot_dimension_numbers<[1], [0], [0], [1], [0, 0, 1, 1], [], []>} : vector<8x768xbf16>, vector<768x128xbf16>, vector<8x128xf32> -> vector<8x128xf32>
    %c0_3 = arith.constant 0 : index
    %c0_4 = arith.constant 0 : index
    %4 = vector.load %arg3[%c0_3, %c0_4] : memref<1x128xf32, #tpu.memory_space<vmem>>, vector<1x128xf32>
    %5 = vector.broadcast %4 : vector<1x128xf32> to vector<8x128xf32>
    %6 = arith.addf %3, %5 : vector<8x128xf32>
    %c0_5 = arith.constant 0 : index
    %c0_6 = arith.constant 0 : index
    %7 = vector.load %arg4[%c0_5, %c0_6] : memref<8x128xf32, #tpu.memory_space<vmem>>, vector<8x128xf32>
    tpu.vector_store %arg4[%c0_5, %c0_6], %6 {strides = array<i32>} : memref<8x128xf32, #tpu.memory_space<vmem>>, vector<8x128xf32>,
    return
  }
  func.func @transform_0(%arg0: i32) -> (i32, i32) {
    %c0_i32 = arith.constant 0 : i32
    %c0_i32_0 = arith.constant 0 : i32
    return %arg0, %c0_i32 : i32, i32
  }
  func.func @transform_1(%arg0: i32) -> (i32, i32) {
    %c0_i32 = arith.constant 0 : i32
    %c0_i32_0 = arith.constant 0 : i32
    %c0_i32_1 = arith.constant 0 : i32
    return %c0_i32, %c0_i32_0 : i32, i32
  }
  func.func @transform_2(%arg0: i32) -> (i32, i32) {
    %c0_i32 = arith.constant 0 : i32
    %c0_i32_0 = arith.constant 0 : i32
    %c0_i32_1 = arith.constant 0 : i32
    return %c0_i32, %c0_i32_0 : i32, i32
  }
  func.func @transform_3(%arg0: i32) -> (i32, i32) {
    %c0_i32 = arith.constant 0 : i32
    %c0_i32_0 = arith.constant 0 : i32
    return %arg0, %c0_i32 : i32, i32
  }
}

</mosaic_0001>

<bundles_post_ra>
// kernel: tpu_custom_call.1
= control target key start
LH: loop header
LB: loop body
LE: loop exit
PB: predicated region body
PF: predicated region fallthrough
CT: control target
= control target key end

     0   :  { %8 = vsyncpa [#allocation3], 0  ;;  %s893_s0 = inlined_call_operand.hbm [shape: f32[8,768], index: 0, kind: input, shape index: {}]   ;;  %s894_s1 = inlined_call_operand.hbm [shape: bf16[768,128], index: 1, kind: input, shape index: {}]   ;;  %s895_s2 = inlined_call_operand.vmem [shape: f32[1,128], index: 2, kind: input, shape index: {}]   ;;  %s896_s3 = inlined_call_operand.hbm [shape: f32[8,128], index: 3, kind: output, shape index: {}]  }
   0x1   :  { %9 = vsyncpa [#allocation6], 0 }
   0x2   :  { %10 = vsyncpa [#allocation4], 0  ;;  %s822_s12 = smov [#allocation2]   ;;  %s823_s14 = smov [#allocation5]  }
   0x3   :  { %s17_s13 = sshll.u32 %s822_s12, 4  ;;  %s26_s15 = sshll.u32 %s823_s14, 4  ;;  %s18_s13 = int_to_ptr.vmem [resolvable:$true] %s17_s13  ;;  %s847_s15 = int_to_ptr.vmem [resolvable:$true] %s26_s15 }
   0x4   :  { %s750_s18 = scalar_lea.hbm %s893_s0, 768 }
   0x5   :  { %p751_p0 = scmp.ne.s32.totalorder %s893_s0, %s750_s18  ;;  %p754_p1 = scmp.lt.u32.totalorder %s750_s18, %s893_s0 }
   0x7   :  { %p756_p2 = pnand %p754_p1, %p751_p0 }
   0x9   :  { %759 = shalt.err (!%p756_p2)
}
   0xa   :  { %s760_s23 = scalar_lea.vmem %s18_s13, 768  ;;  %p765_p4 = scmp.lt.s32.totalorder %s18_s13, %s18_s13 }
   0xb   :  { %p761_p3 = scmp.ne.s32.totalorder %s18_s13, %s760_s23  ;;  %p766_p5 = scmp.lt.s32.totalorder %s760_s23, %s760_s23 }
   0xd   :  { %p767_p6 = por %p766_p5, %p765_p4 }
   0xf   :  { %p768_p7 = pnand %p767_p6, %p761_p3 }
  0x11   :  { %771 = shalt.err (!%p768_p7)
}
  0x12   :  { %20 = dma.hbm_to_vmem [thread:$0]  %s893_s0, 768, %s18_s13, [#allocation3]  }
  0x13   :  { %s772_s28 = scalar_lea.hbm %s894_s1, 6144 }
  0x14   :  { %p773_p8 = scmp.ne.s32.totalorder %s894_s1, %s772_s28  ;;  %p776_p9 = scmp.lt.u32.totalorder %s772_s28, %s894_s1 }
  0x16   :  { %p778_p10 = pnand %p776_p9, %p773_p8 }
  0x18   :  { %781 = shalt.err (!%p778_p10)
}
  0x19   :  { %s782_s6 = scalar_lea.vmem %s847_s15, 6144  ;;  %p787_p12 = scmp.lt.s32.totalorder %s847_s15, %s847_s15 }
  0x1a   :  { %p783_p11 = scmp.ne.s32.totalorder %s847_s15, %s782_s6  ;;  %p788_p13 = scmp.lt.s32.totalorder %s782_s6, %s782_s6 }
  0x1c   :  { %p789_p0 = por %p788_p13, %p787_p12 }
  0x1e   :  { %p790_p1 = pnand %p789_p0, %p783_p11 }
  0x20   :  { %793 = shalt.err (!%p790_p1)
}
  0x21   :  { %s824_s0 = smov 64   ;;  %s825_s7 = smov 4  }
  0x22   :  { %32 = dma.hbm_to_vmem [thread:$0]  %s894_s1, 6144, %s847_s15, [#allocation6], %s824_s0, %s824_s0, %s825_s7  }
  0x23   :  { %816 = dma.done.wait [#allocation3], 768  }
  0x24   :  { %817 = vsyncadd [#allocation3], 4294966528 }
  0x25   :  { %818 = dma.done.wait [#allocation6], 6144  }
  0x26   :  { %819 = vsyncadd [#allocation6], 4294961152  ;;  %v702_v0 = vld [vmem:[#allocation5 + $0x40] sm:$0xff]   ;;  %v706_v4 = vld [vmem:[#allocation5 + $0x48] sm:$0xff]   ;;  %s826_s11 = smov [#allocation7]  }
  0x27   :  { %v703_v1 = vld [vmem:[#allocation5] sm:$0xff]   ;;  %631 = vmatprep.subr.bf16.mxu0 %v702_v0  ;;  %v707_v5 = vld [vmem:[#allocation5 + $0x8] sm:$0xff]   ;;  %v710_v8 = vld [vmem:[#allocation5 + $0x50] sm:$0xff]   ;;  %s572_s12 = sshll.u32 %s826_s11, 4  ;;  %s573_s12 = int_to_ptr.vmem [resolvable:$true] %s572_s12 }
  0x28   :  { %v704_v2 = vld [vmem:[#allocation5 + $0xc0] sm:$0xff]   ;;  %632 = vmatpush3.bf16.msra.mxu0 %v703_v1  ;;  %v708_v6 = vld [vmem:[#allocation5 + $0xc8] sm:$0xff]   ;;  %v711_v9 = vld [vmem:[#allocation5 + $0x10] sm:$0xff]   ;;  %p799_p3 = scmp.lt.s32.totalorder %s573_s12, %s573_s12 }
  0x29   :  { %v705_v3 = vld [vmem:[#allocation5 + $0x80] sm:$0xff]   ;;  %653 = vmatprep.subr.bf16.mxu1 %v704_v2  ;;  %633 = vmatprep.subr.bf16.mxu0 %v706_v4  ;;  %v709_v7 = vld [vmem:[#allocation5 + $0x88] sm:$0xff]   ;;  %v712_v10 = vld [vmem:[#allocation5 + $0xd0] sm:$0xff]  }
  0x2a   :  { %654 = vmatpush3.bf16.msra.mxu1 %v705_v3  ;;  %v713_v11 = vld [vmem:[#allocation5 + $0x90] sm:$0xff]   ;;  %v714_v12 = vld [vmem:[#allocation5 + $0x58] sm:$0xff]   ;;  %v718_v16 = vld [vmem:[#allocation5 + $0x60] sm:$0xff]  }
  0x2b   :  { %655 = vmatprep.subr.bf16.mxu1 %v708_v6  ;;  %v715_v13 = vld [vmem:[#allocation5 + $0x18] sm:$0xff]   ;;  %v719_v17 = vld [vmem:[#allocation5 + $0x20] sm:$0xff]   ;;  %v722_v20 = vld [vmem:[#allocation5 + $0x68] sm:$0xff]  }
  0x2c   :  { %634 = vmatpush3.bf16.msra.mxu0 %v707_v5  ;;  %v716_v14 = vld [vmem:[#allocation5 + $0xd8] sm:$0xff]   ;;  %v720_v18 = vld [vmem:[#allocation5 + $0xe0] sm:$0xff]   ;;  %v723_v21 = vld [vmem:[#allocation5 + $0x28] sm:$0xff]  }
  0x2d   :  { %635 = vmatprep.subr.bf16.mxu0 %v710_v8  ;;  %v717_v15 = vld [vmem:[#allocation5 + $0x98] sm:$0xff]   ;;  %v721_v19 = vld [vmem:[#allocation5 + $0xa0] sm:$0xff]   ;;  %v724_v22 = vld [vmem:[#allocation5 + $0xe8] sm:$0xff]  }
  0x2e   :  { %656 = vmatpush3.bf16.msra.mxu1 %v709_v7  ;;  %v725_v23 = vld [vmem:[#allocation5 + $0xa8] sm:$0xff]   ;;  %v726_v24 = vld [vmem:[#allocation5 + $0x70] sm:$0xff]   ;;  %v730_v28 = vld [vmem:[#allocation5 + $0x78] sm:$0xff]  }
  0x2f   :  { %657 = vmatprep.subr.bf16.mxu1 %v712_v10  ;;  %v727_v25 = vld [vmem:[#allocation5 + $0x30] sm:$0xff]   ;;  %v731_v29 = vld [vmem:[#allocation5 + $0x38] sm:$0xff]   ;;  %v734_v36 = vld [vmem:[#allocation5 + $0x140] sm:$0xff]  }
  0x30   :  { %636 = vmatpush3.bf16.msra.mxu0 %v711_v9  ;;  %v728_v26 = vld [vmem:[#allocation5 + $0xf0] sm:$0xff]   ;;  %v732_v30 = vld [vmem:[#allocation5 + $0xf8] sm:$0xff]   ;;  %v45_v37 = vld [vmem:[#allocation2 + $0x18] sm:$0xff] }
  0x31   :  { %637 = vmatprep.subr.bf16.mxu0 %v714_v12  ;;  %v729_v27 = vld [vmem:[#allocation5 + $0xb0] sm:$0xff]   ;;  %v43_v31 = vld [vmem:[#allocation2 + $0x8] sm:$0xff]  ;;  %v51_v38 = vpack.c.bf16 %v45_v37, %v45_v37  ;;  %v735_v39 = vld [vmem:[#allocation5 + $0x100] sm:$0xff]  }
  0x32   :  { %658 = vmatpush3.bf16.msra.mxu1 %v713_v11  ;;  %v49_v32 = vpack.c.bf16 %v43_v31, %v43_v31  ;;  %v733_v33 = vld [vmem:[#allocation5 + $0xb8] sm:$0xff]   ;;  %v42_v34 = vld [vmem:[#allocation2] sm:$0xff]  ;;  %v44_v40 = vld [vmem:[#allocation2 + $0x10] sm:$0xff] }
  0x33   :  { %659 = vmatprep.subr.bf16.mxu1 %v716_v14  ;;  %v48_v35 = vpack.c.bf16 %v42_v34, %v42_v34  ;;  %517 = vmatprep.mubr.bf16.mxu1 %v51_v38  ;;  %v50_v41 = vpack.c.bf16 %v44_v40, %v44_v40  ;;  %v736_v42 = vld [vmem:[#allocation5 + $0x148] sm:$0xff]   ;;  %v738_v44 = vld [vmem:[#allocation5 + $0x150] sm:$0xff]   ;;  %v740_v46 = vld [vmem:[#allocation5 + $0x158] sm:$0xff]  }
  0x34   :  { %638 = vmatpush3.bf16.msra.mxu0 %v715_v13  ;;  %477 = vmatprep.mubr.bf16.mxu0 %v49_v32  ;;  %v737_v43 = vld [vmem:[#allocation5 + $0x108] sm:$0xff]   ;;  %v739_v45 = vld [vmem:[#allocation5 + $0x110] sm:$0xff]   ;;  %v741_v47 = vld [vmem:[#allocation5 + $0x118] sm:$0xff]  }
  0x35   :  { %639 = vmatprep.subr.bf16.mxu0 %v718_v16  ;;  %v742_v48 = vld [vmem:[#allocation5 + $0x160] sm:$0xff]   ;;  %v744_v50 = vld [vmem:[#allocation5 + $0x168] sm:$0xff]   ;;  %v47_v51 = vld [vmem:[#allocation2 + $0x28] sm:$0xff] }
  0x36   :  { %660 = vmatpush3.bf16.msra.mxu1 %v717_v15  ;;  %v743_v49 = vld [vmem:[#allocation5 + $0x120] sm:$0xff]   ;;  %v53_v52 = vpack.c.bf16 %v47_v51, %v47_v51  ;;  %v745_v53 = vld [vmem:[#allocation5 + $0x128] sm:$0xff]   ;;  %v746_v54 = vld [vmem:[#allocation5 + $0x170] sm:$0xff]  }
  0x37   :  { %661 = vmatprep.subr.bf16.mxu1 %v720_v18  ;;  %v747_v55 = vld [vmem:[#allocation5 + $0x130] sm:$0xff]   ;;  %v748_v56 = vld [vmem:[#allocation5 + $0x178] sm:$0xff]  }
  0x38   :  { %640 = vmatpush3.bf16.msra.mxu0 %v719_v17  ;;  %v749_v57 = vld [vmem:[#allocation5 + $0x138] sm:$0xff]   ;;  %v46_v58 = vld [vmem:[#allocation2 + $0x20] sm:$0xff] }
  0x39   :  { %641 = vmatprep.subr.bf16.mxu0 %v722_v20  ;;  %v52_v59 = vpack.c.bf16 %v46_v58, %v46_v58  ;;  %v582_v61 = vld [vmem:[%s895_s2] ss:$0 sm:$0xff]  ;;  %s794_s2 = scalar_lea.vmem %s573_s12, 128 }
  0x3a   :  { %662 = vmatpush3.bf16.msra.mxu1 %v721_v19  ;;  %p795_p2 = scmp.ne.s32.totalorder %s573_s12, %s794_s2  ;;  %p800_p4 = scmp.lt.s32.totalorder %s794_s2, %s794_s2 }
  0x3b   :  { %663 = vmatprep.subr.bf16.mxu1 %v724_v22 }
  0x3c   :  { %642 = vmatpush3.bf16.msra.mxu0 %v723_v21  ;;  %p801_p5 = por %p800_p4, %p799_p3 }
  0x3d   :  { %643 = vmatprep.subr.bf16.mxu0 %v726_v24 }
  0x3e   :  { %664 = vmatpush3.bf16.msra.mxu1 %v725_v23  ;;  %p802_p6 = pnand %p801_p5, %p795_p2 }
  0x3f   :  { %665 = vmatprep.subr.bf16.mxu1 %v728_v26 }
  0x40   :  { %644 = vmatpush3.bf16.msra.mxu0 %v727_v25 }
  0x41   :  { %645 = vmatprep.subr.bf16.mxu0 %v730_v28 }
  0x42   :  { %666 = vmatpush3.bf16.msra.mxu1 %v729_v27 }
  0x43   :  { %667 = vmatprep.subr.bf16.mxu1 %v732_v30 }
  0x44   :  { %646 = vmatpush3.bf16.msra.mxu0 %v731_v29 }
  0x45   :  { %675 = vmatprep.subr.bf16.mxu0 %v734_v36 }
  0x46   :  { %668 = vmatpush3.bf16.msra.mxu1 %v733_v33 }
  0x47   :  { %478 = vmatmul.mubr.bf16.vlgmr.msra.gmra.mrb[0].mxu0 %v48_v35 }
  0x48   :  { %676 = vmatpush3.bf16.msra.mxu0 %v735_v39  ;;  %557 = vmatprep.mubr.bf16.mxu0 %v53_v52 }
  0x49   :  { %518 = vmatmul.mubr.bf16.vlgmr.msra.gmra.mrb[0].mxu1 %v50_v41  ;;  %677 = vmatprep.subr.bf16.mxu0 %v736_v42 }
  0x4c   :  { %678 = vmatpush3.bf16.msra.mxu0 %v737_v43 }
  0x4d   :  { %679 = vmatprep.subr.bf16.mxu0 %v738_v44 }
  0x50   :  { %680 = vmatpush3.bf16.msra.mxu0 %v739_v45 }
  0x51   :  { %681 = vmatprep.subr.bf16.mxu0 %v740_v46 }
  0x54   :  { %682 = vmatpush3.bf16.msra.mxu0 %v741_v47 }
  0x55   :  { %683 = vmatprep.subr.bf16.mxu0 %v742_v48 }
  0x58   :  { %684 = vmatpush3.bf16.msra.mxu0 %v743_v49 }
  0x59   :  { %685 = vmatprep.subr.bf16.mxu0 %v744_v50 }
  0x5c   :  { %686 = vmatpush3.bf16.msra.mxu0 %v745_v53 }
  0x5d   :  { %687 = vmatprep.subr.bf16.mxu0 %v746_v54 }
  0x60   :  { %688 = vmatpush3.bf16.msra.mxu0 %v747_v55 }
  0x61   :  { %689 = vmatprep.subr.bf16.mxu0 %v748_v56 }
  0x64   :  { %690 = vmatpush3.bf16.msra.mxu0 %v749_v57 }
  0x67   :  { %558 = vmatmul.mubr.bf16.vlgmr.msra.gmra.mrb[4].mxu0 %v52_v59 }
 0x11a   :  { %v647_v60 = vpop.f32.mrb[0].mxu0 }
 0x11b   :  { %v648_v62 = vpop.f32.mrb[1].mxu0 }
 0x11c   :  { %v649_v63 = vadd.f32 %v648_v62, %v647_v60  ;;  %v650_v0 = vpop.f32.mrb[2].mxu0  ;;  %v669_v1 = vpop.f32.mrb[0].mxu1 }
 0x11d   :  { %v651_v2 = vpop.f32.mrb[3].mxu0  ;;  %v670_v4 = vpop.f32.mrb[1].mxu1 }
 0x11e   :  { %v480_v3 = vadd.f32 %v649_v63, %v582_v61  ;;  %v671_v5 = vadd.f32 %v670_v4, %v669_v1  ;;  %v672_v6 = vpop.f32.mrb[2].mxu1 }
 0x11f   :  { %v673_v7 = vpop.f32.mrb[3].mxu1 }
 0x120   :  { %v520_v8 = vadd.f32 %v671_v5, %v480_v3 }
 0x13a   :  { %v691_v9 = vpop.f32.mrb[4].mxu0 }
 0x13b   :  { %v692_v10 = vpop.f32.mrb[5].mxu0 }
 0x13c   :  { %v693_v11 = vadd.f32 %v692_v10, %v691_v9  ;;  %v694_v12 = vpop.f32.mrb[6].mxu0 }
 0x13d   :  { %v695_v13 = vpop.f32.mrb[7].mxu0 }
 0x13e   :  { %v560_v14 = vadd.f32 %v693_v11, %v520_v8 }
 0x140   :  { %565 = vst [vmem:[#allocation7] sm:$0xff] %v560_v14 }
 0x141   :  { %805 = shalt.err (!%p802_p6)
}
 0x142   :  { %s806_s15 = scalar_lea.hbm %s896_s3, 128 }
 0x143   :  { %p807_p7 = scmp.ne.s32.totalorder %s896_s3, %s806_s15  ;;  %p810_p8 = scmp.lt.u32.totalorder %s806_s15, %s896_s3 }
 0x145   :  { %p812_p9 = pnand %p810_p8, %p807_p7 }
 0x147   :  { %815 = shalt.err (!%p812_p9)
}
 0x148   :  { %575 = dma.vmem_to_hbm [thread:$0]  %s573_s12, 128, %s896_s3, [#allocation4]  }
 0x149   :  { %820 = dma.done.wait [#allocation4], 128  }
 0x14a   :  { %821 = vsyncadd [#allocation4], 4294967168 }
 0x14b   :  { %579 = vsyncpa [#allocation3], 1 }
 0x14c   :  { %580 = vsyncpa [#allocation6], 1 }
 0x14d   :  { %581 = vsyncpa [#allocation4], 1 }

</bundles_post_ra>
